<compile_context>
chip_gen: v7x
topology: tpu7x:2x2x1
jax: 0.10.0
libtpu: 0.0.40
codegen_flags: <defaults>
</compile_context>

<pallas_src>
import functools

import jax
import jax.numpy as jnp
from jax.experimental import pallas as pl
from jax.experimental.pallas import tpu as pltpu


def _label_smoothing_kernel(pred_ref, target_ref, out_ref, acc_ref, *,
                            classes, smoothing, total_rows, tile_rows,
                            steps_per_core, needs_mask):
    core = pl.program_id(0)           # parallel axis (megacore split on v7x)
    step = pl.program_id(1)           # arbitrary (reduction) axis
    n_steps = pl.num_programs(1)

    confidence = jnp.float32(1.0 - smoothing)
    smooth_val = (jnp.float32(smoothing / (classes - 1))
                  if classes > 1 else jnp.float32(0.0))

    @pl.when(step == 0)
    def _():
        acc_ref[...] = jnp.zeros_like(acc_ref)

    pred = pred_ref[...].astype(jnp.float32)      # (TN, C), all math in f32
    tgt = target_ref[...]                         # (TN, 1) int32
    tn, nc = pred.shape

    # Stable log-softmax pieces: logp = z - lse, z = pred - rowmax.
    m = jnp.max(pred, axis=-1, keepdims=True)
    z = pred - m
    lse = jnp.log(jnp.sum(jnp.exp(z), axis=-1, keepdims=True))     # (TN, 1)

    # Fused weighted reduce (smoothed distribution sums to 1):
    #   per_row = -(sum_j w_j*z_j - lse) = lse - sum_j w_j*z_j
    col = jax.lax.broadcasted_iota(jnp.int32, (tn, nc), 1)
    w = jnp.where(col == tgt, confidence, smooth_val)
    weighted = jnp.sum(w * z, axis=-1, keepdims=True)               # (TN, 1)

    per_row = lse - weighted                                        # (TN, 1)

    if needs_mask:
        # Mask rows past the true batch size (partial last block and fully
        # out-of-range blocks clamped by the index_map).  Keep this as a
        # select so garbage-row NaN/Inf never reaches the accumulator.
        blk = core * steps_per_core + step
        row = jax.lax.broadcasted_iota(jnp.int32, (tn, 1), 0) + blk * tile_rows
        per_row = jnp.where(row < total_rows, per_row, 0.0)

    acc_ref[...] += per_row

    @pl.when(step == n_steps - 1)
    def _():
        partial = jnp.sum(acc_ref[...])                             # scalar f32
        # Lane-dense (1, 8, 128) block; wrapper reads [:, 0, 0].
        out_ref[...] = jnp.broadcast_to(partial, out_ref.shape)


def label_smoothing_loss(pred, target, *, classes, smoothing=0.0,
                         tile_budget_bytes=4 << 20, block_rows=None,
                         num_cores=2, buffer_count=None):
    """pred: (N, C) float (f32 or bf16), target: (N,) int -> scalar f32 loss."""
    n, c = pred.shape
    assert c == classes
    target2d = target.astype(jnp.int32).reshape(n, 1)

    itemsize = jnp.dtype(pred.dtype).itemsize

    # Honest working-set per row: double-buffered pred block (2 * itemsize)
    # plus ~3 f32 temporaries per element (upcast / z / exp / weights).
    bytes_per_row = c * (2 * itemsize + 3 * 4) + 16
    if block_rows is None:
        max_rows = max(8, (tile_budget_bytes // bytes_per_row) // 8 * 8)
    else:
        max_rows = max(8, (block_rows // 8) * 8)

    tile_n = n if n <= max_rows else max_rows        # full dim or multiple of 8
    total_blocks = pl.cdiv(n, tile_n)
    cores = max(1, min(int(num_cores), total_blocks))
    steps_per_core = pl.cdiv(total_blocks, cores)
    # Does the (cores x steps) grid cover exactly n rows?  If yes, the
    # padded-row mask is statically removed from the kernel.
    needs_mask = (cores * steps_per_core * tile_n) != n

    last_block = total_blocks - 1

    def in_map(ci, si):
        # Clamp so no block is fully out of range (clamped blocks reread the
        # last valid block; their rows are masked out logically).
        return (jnp.minimum(ci * steps_per_core + si, last_block), 0)

    def out_map(ci, si):
        return (ci, 0, 0)

    kernel = functools.partial(
        _label_smoothing_kernel,
        classes=classes, smoothing=float(smoothing),
        total_rows=n, tile_rows=tile_n,
        steps_per_core=steps_per_core, needs_mask=needs_mask,
    )

    pred_spec_kwargs = {}
    if buffer_count is not None:
        # Optional deeper pipelining (e.g. v5e where VMEM is plentiful).
        pred_spec_kwargs["pipeline_mode"] = pl.Buffered(int(buffer_count))

    cost = pl.CostEstimate(
        flops=int(6 * n * c),
        transcendentals=int(n * c),
        bytes_accessed=int(n * c * itemsize + n * 4 + cores * 8 * 128 * 4),
    )

    out = pl.pallas_call(
        kernel,
        out_shape=jax.ShapeDtypeStruct((cores, 8, 128), jnp.float32),
        grid_spec=pltpu.PrefetchScalarGridSpec(
            num_scalar_prefetch=0,
            grid=(cores, steps_per_core),
            in_specs=[
                pl.BlockSpec((tile_n, c), in_map, **pred_spec_kwargs),
                pl.BlockSpec((tile_n, 1), in_map),
            ],
            out_specs=pl.BlockSpec((1, 8, 128), out_map),
            scratch_shapes=[pltpu.VMEM((tile_n, 1), jnp.float32)],
        ),
        compiler_params=pltpu.CompilerParams(
            dimension_semantics=("parallel", "arbitrary"),
            vmem_limit_bytes=32 * 1024 * 1024,
        ),
        cost_estimate=cost,
    )(pred, target2d)

    # Merge per-core partials and normalize by the *global* N in the wrapper
    # (required for correctness once the batch axis is split across cores).
    return jnp.sum(out[:, 0, 0]) / jnp.float32(n)


def _reference(pred, target, *, classes, smoothing):
    confidence = 1.0 - smoothing
    logp = jax.nn.log_softmax(pred.astype(jnp.float32), axis=-1)
    true_dist = jnp.full_like(logp, smoothing / (classes - 1))
    true_dist = true_dist.at[jnp.arange(pred.shape[0]), target].set(confidence)
    return jnp.mean(jnp.sum(-true_dist * logp, axis=-1))


if __name__ == "__main__":
    smoothing = 0.1
    key = jax.random.PRNGKey(0)

    def check(pred, target, classes, **kw):
        loss = jax.block_until_ready(
            label_smoothing_loss(pred, target, classes=classes,
                                 smoothing=smoothing, **kw))
        ref = _reference(pred, target, classes=classes, smoothing=smoothing)
        tol = 5e-3 if pred.dtype == jnp.bfloat16 else 1e-5
        assert jnp.allclose(loss, ref, atol=tol, rtol=tol), (loss, ref)

    # Case 1: small single-block case (N=8, C=32) -> one core, one step.
    N, C = 8, 32
    kp, kt, key = jax.random.split(key, 3)
    pred = jax.random.normal(kp, (N, C), dtype=jnp.float32)
    target = jax.random.randint(kt, (N,), 0, C, dtype=jnp.int32)
    check(pred, target, C)

    # Case 2: multi-step grid with remainder block and a clamped OOB block
    # (N=20, block_rows=8 -> 3 data blocks, 2x2 grid) -> accumulator +
    # row-mask + clamp path.
    N2, C2 = 20, 32
    kp2, kt2, key = jax.random.split(key, 3)
    pred2 = jax.random.normal(kp2, (N2, C2), dtype=jnp.float32)
    target2 = jax.random.randint(kt2, (N2,), 0, C2, dtype=jnp.int32)
    check(pred2, target2, C2, block_rows=8)

    # Case 3: exactly-divisible grid (N=16, block_rows=8, 2 cores x 1 step)
    # -> mask statically skipped.
    N3, C3 = 16, 32
    kp3, kt3, key = jax.random.split(key, 3)
    pred3 = jax.random.normal(kp3, (N3, C3), dtype=jnp.float32)
    target3 = jax.random.randint(kt3, (N3,), 0, C3, dtype=jnp.int32)
    check(pred3, target3, C3, block_rows=8)

    # Case 4: bf16 input (halves HBM bytes; math stays f32 in-kernel).
    check(pred2.astype(jnp.bfloat16), target2, C2, block_rows=8)

    print("KERNEL_OK")
</pallas_src>

<mosaic_0001>
module attributes {stable_mosaic.version = 11 : i64} {
  func.func @_label_smoothing_kernel(%arg0: i32, %arg1: i32, %arg2: memref<8x32xf32, #tpu.memory_space<vmem>>, %arg3: memref<8x1xi32, #tpu.memory_space<vmem>>, %arg4: memref<1x8x128xf32, #tpu.memory_space<vmem>>, %arg5: memref<8x1xf32, #tpu.memory_space<vmem>>) attributes {dimension_semantics = [#tpu.dimension_semantics<parallel>, #tpu.dimension_semantics<arbitrary>], iteration_bounds = array<i64: 1, 1>, scalar_prefetch = 0 : i64, scratch_operands = 1 : i64, tpu.core_type = #tpu.core_type<tc>, window_params = [{transform_indices = @transform_0, window_bounds = array<i64: 8, 32>}, {transform_indices = @transform_1, window_bounds = array<i64: 8, 1>}, {transform_indices = @transform_2, window_bounds = array<i64: 1, 8, 128>}]} {
    %c0_i32 = arith.constant 0 : i32
    %0 = arith.cmpi eq, %arg1, %c0_i32 : i32
    %1 = arith.extui %0 : i1 to i32
    %c0_i32_0 = arith.constant 0 : i32
    %2 = arith.cmpi ne, %1, %c0_i32_0 : i32
    scf.if %2 {
      %cst_14 = arith.constant 0.000000e+00 : f32
      %29 = vector.broadcast %cst_14 : f32 to vector<8x1xf32>
      %c0_15 = arith.constant 0 : index
      %c0_16 = arith.constant 0 : index
      %30 = vector.load %arg5[%c0_15, %c0_16] : memref<8x1xf32, #tpu.memory_space<vmem>>, vector<8x1xf32>
      tpu.vector_store %arg5[%c0_15, %c0_16], %29 {strides = array<i32>} : memref<8x1xf32, #tpu.memory_space<vmem>>, vector<8x1xf32>,
    } else {
    }
    %c0 = arith.constant 0 : index
    %c0_1 = arith.constant 0 : index
    %3 = vector.load %arg2[%c0, %c0_1] : memref<8x32xf32, #tpu.memory_space<vmem>>, vector<8x32xf32>
    %c0_2 = arith.constant 0 : index
    %c0_3 = arith.constant 0 : index
    %4 = vector.load %arg3[%c0_2, %c0_3] : memref<8x1xi32, #tpu.memory_space<vmem>>, vector<8x1xi32>
    %cst = arith.constant dense<0xFF800000> : vector<8xf32>
    %5 = vector.multi_reduction <maximumf>, %3, %cst [1] : vector<8x32xf32> to vector<8xf32>
    %6 = vector.shape_cast %5 : vector<8xf32> to vector<8x1xf32>
    %7 = vector.broadcast %6 : vector<8x1xf32> to vector<8x32xf32>
    %8 = arith.subf %3, %7 : vector<8x32xf32>
    %9 = math.exp %8 : vector<8x32xf32>
    %cst_4 = arith.constant dense<0.000000e+00> : vector<8xf32>
    %10 = vector.multi_reduction <add>, %9, %cst_4 [1] : vector<8x32xf32> to vector<8xf32>
    %11 = vector.shape_cast %10 : vector<8xf32> to vector<8x1xf32>
    %12 = math.log %11 : vector<8x1xf32>
    %13 = tpu.iota {dimensions = array<i32: 1>} : vector<8x32xi32>
    %14 = vector.broadcast %4 : vector<8x1xi32> to vector<8x32xi32>
    %15 = arith.cmpi eq, %13, %14 : vector<8x32xi32>
    %cst_5 = arith.constant 0.899999976 : f32
    %cst_6 = arith.constant 0.0032258064 : f32
    %16 = vector.broadcast %cst_5 : f32 to vector<8x32xf32>
    %17 = vector.broadcast %cst_6 : f32 to vector<8x32xf32>
    %18 = arith.select %15, %16, %17 : vector<8x32xi1>, vector<8x32xf32>
    %19 = arith.mulf %18, %8 : vector<8x32xf32>
    %cst_7 = arith.constant dense<0.000000e+00> : vector<8xf32>
    %20 = vector.multi_reduction <add>, %19, %cst_7 [1] : vector<8x32xf32> to vector<8xf32>
    %21 = vector.shape_cast %20 : vector<8xf32> to vector<8x1xf32>
    %22 = arith.subf %12, %21 : vector<8x1xf32>
    %c0_8 = arith.constant 0 : index
    %c0_9 = arith.constant 0 : index
    %23 = vector.load %arg5[%c0_8, %c0_9] : memref<8x1xf32, #tpu.memory_space<vmem>>, vector<8x1xf32>
    %24 = arith.addf %23, %22 : vector<8x1xf32>
    %c0_10 = arith.constant 0 : index
    %c0_11 = arith.constant 0 : index
    %25 = vector.load %arg5[%c0_10, %c0_11] : memref<8x1xf32, #tpu.memory_space<vmem>>, vector<8x1xf32>
    tpu.vector_store %arg5[%c0_10, %c0_11], %24 {strides = array<i32>} : memref<8x1xf32, #tpu.memory_space<vmem>>, vector<8x1xf32>,
    %c0_i32_12 = arith.constant 0 : i32
    %26 = arith.cmpi eq, %arg1, %c0_i32_12 : i32
    %27 = arith.extui %26 : i1 to i32
    %c0_i32_13 = arith.constant 0 : i32
    %28 = arith.cmpi ne, %27, %c0_i32_13 : i32
    scf.if %28 {
      %c0_14 = arith.constant 0 : index
      %c0_15 = arith.constant 0 : index
      %29 = vector.load %arg5[%c0_14, %c0_15] : memref<8x1xf32, #tpu.memory_space<vmem>>, vector<8x1xf32>
      %30 = vector.shape_cast %29 : vector<8x1xf32> to vector<1x8x1xf32>
      %cst_16 = arith.constant dense<0.000000e+00> : vector<1xf32>
      %31 = vector.multi_reduction <add>, %30, %cst_16 [1, 2] : vector<1x8x1xf32> to vector<1xf32>
      %32 = vector.shape_cast %31 : vector<1xf32> to vector<1x1x1xf32>
      %33 = vector.extract %32[0, 0, 0] : f32 from vector<1x1x1xf32>
      %34 = vector.broadcast %33 : f32 to vector<1x8x128xf32>
      %c0_17 = arith.constant 0 : index
      %c0_18 = arith.constant 0 : index
      %c0_19 = arith.constant 0 : index
      %35 = vector.load %arg4[%c0_17, %c0_18, %c0_19] : memref<1x8x128xf32, #tpu.memory_space<vmem>>, vector<1x8x128xf32>
      tpu.vector_store %arg4[%c0_17, %c0_18, %c0_19], %34 {strides = array<i32>} : memref<1x8x128xf32, #tpu.memory_space<vmem>>, vector<1x8x128xf32>,
    } else {
    }
    return
  }
  func.func @transform_0(%arg0: i32, %arg1: i32) -> (i32, i32) {
    %c1_i32 = arith.constant 1 : i32
    %0 = arith.muli %arg0, %c1_i32 : i32
    %1 = arith.addi %0, %arg1 : i32
    %c0_i32 = arith.constant 0 : i32
    %2 = arith.minsi %1, %c0_i32 : i32
    %c0_i32_0 = arith.constant 0 : i32
    %c0_i32_1 = arith.constant 0 : i32
    return %2, %c0_i32_0 : i32, i32
  }
  func.func @transform_1(%arg0: i32, %arg1: i32) -> (i32, i32) {
    %c1_i32 = arith.constant 1 : i32
    %0 = arith.muli %arg0, %c1_i32 : i32
    %1 = arith.addi %0, %arg1 : i32
    %c0_i32 = arith.constant 0 : i32
    %2 = arith.minsi %1, %c0_i32 : i32
    %c0_i32_0 = arith.constant 0 : i32
    %c0_i32_1 = arith.constant 0 : i32
    return %2, %c0_i32_0 : i32, i32
  }
  func.func @transform_2(%arg0: i32, %arg1: i32) -> (i32, i32, i32) {
    %c0_i32 = arith.constant 0 : i32
    %c0_i32_0 = arith.constant 0 : i32
    %c0_i32_1 = arith.constant 0 : i32
    return %arg0, %c0_i32, %c0_i32_0 : i32, i32, i32
  }
}

</mosaic_0001>

<bundles_post_ra>
// kernel: tpu_custom_call.1
= control target key start
LH: loop header
LB: loop body
LE: loop exit
PB: predicated region body
PF: predicated region fallthrough
CT: control target
= control target key end

     0   :  { %vm74_vm0 = vcmask 261120   ;;  %s219_s0 = inlined_call_operand.vmem [shape: f32[8,32], index: 0, kind: input, shape index: {}]   ;;  %s220_s1 = inlined_call_operand.vmem [shape: s32[8,1], index: 1, kind: input, shape index: {}]   ;;  %s221_s2 = inlined_call_operand.hbm [shape: f32[1,8,128], index: 2, kind: output, shape index: {}]  }
   0x1   :  { %v72_v0 = vld [vmem:[%s219_s0] sm:$0xff] }
   0x2   :  { %7 = vsyncpa [#allocation4], 0  ;;  %v75_v1 = vsel %vm74_vm0, %v72_v0, -inf  ;;  %v179_v2 = vmov 0   ;;  %v73_v3 = vld [vmem:[%s220_s1] sm:$0xff]  ;;  %v86_v6 = vlaneseq  ;;  %vm70_vm2 = vcmask 7168  }
   0x3   :  { %150 = vset.pattern.permute.xlu0 %v179_v2  ;;  %v180_v10 = vmov 0.0032258064   ;;  %v181_v16 = vmov 0.0   ;;  %s182_s0 = smov [#allocation3]  }
   0x4   :  { %76 = vmax.xlane.f32.xlu0 %v75_v1  ;;  %v87_v8 = vand.u32 127, %v86_v6  ;;  %71 = vst.msk [vmem:[#allocation2] sm:$0xff] %vm70_vm2, %v181_v16  ;;  %s124_s1 = sshll.u32 %s182_s0, 4  ;;  %s125_s1 = int_to_ptr.vmem [resolvable:$true] %s124_s1 }
   0x5   :  { %s155_s14 = scalar_lea.vmem %s125_s1, 128  ;;  %p160_p1 = scmp.lt.s32.totalorder %s125_s1, %s125_s1 }
   0x6   :  { %p156_p0 = scmp.ne.s32.totalorder %s125_s1, %s155_s14  ;;  %p161_p2 = scmp.lt.s32.totalorder %s155_s14, %s155_s14 }
   0x8   :  { %p162_p3 = por %p161_p2, %p160_p1 }
   0xa   :  { %p163_p4 = pnand %p162_p3, %p156_p0 }
   0xb   :  { %v98_v21 = vld [vmem:[#allocation2] sm:$0xff] }
  0x1a   :  { %89 = vperm.xlu0 %150, %v73_v3  }
  0x91   :  { %v77_v4 = vpop.xlane.xlu0 %76 }
  0x92   :  { %v78_v5 = vsub.f32 %v72_v0, %v77_v4 }
  0x94   :  { %v79_v7 = vmul.f32 1.442695, %v78_v5 }
  0x96   :  { %151 = vpow2.f32 %v79_v7 }
  0x99   :  { %v90_v9 = vpop.permute.xlu0 %89 }
  0x9a   :  { %vm91_vm1 = vcmp.eq.s32.totalorder %v87_v8, %v90_v9 }
  0x9b   :  { %v92_v11 = vsel %vm91_vm1, 0.9, %v180_v10 }
  0x9c   :  { %v93_v14 = vmul.f32 %v92_v11, %v78_v5 }
  0x9e   :  { %v94_v15 = vsel %vm74_vm0, %v93_v14, 0.0 }
  0xa0   :  { %v152_v12 = vpop.eup %151 }
  0xa1   :  { %v81_v13 = vsel %vm74_vm0, %v152_v12, 0.0 }
  0xa2   :  { %82 = vadd.xlane.f32.xlu1 %v81_v13 }
  0xa6   :  { %95 = vadd.xlane.f32.xlu1 %v94_v15 }
 0x12f   :  { %v83_v17 = vpop.xlane.xlu1 %82 }
 0x130   :  { %153 = vlog2.f32 %v83_v17 }
 0x133   :  { %v96_v20 = vpop.xlane.xlu1 %95 }
 0x13a   :  { %v154_v18 = vpop.eup %153 }
 0x13b   :  { %v85_v19 = vmul.f32 0.6931472, %v154_v18 }
 0x13d   :  { %v97_v22 = vsub.f32 %v85_v19, %v96_v20 }
 0x13f   :  { %v99_v23 = vadd.f32 %v98_v21, %v97_v22 }
 0x141   :  { %101 = vst.msk [vmem:[#allocation2] sm:$0xff] %vm70_vm2, %v99_v23 }
 0x148   :  { %v105_v24 = vld [vmem:[#allocation2] sm:$0xff] }
 0x149   :  { %v106_v25 = vsel %vm70_vm2, %v105_v24, 0.0 }
 0x14a   :  { %107 = vadd.xlane.f32.xlu1 %v106_v25 }
 0x1d7   :  { %v108_v26 = vpop.xlane.xlu1 %107 }
 0x1d8   :  { %v109_v27 = vrot.slane %v108_v26, 4 }
 0x1da   :  { %v110_v28 = vadd.f32 %v109_v27, %v108_v26 }
 0x1dc   :  { %v111_v29 = vrot.slane %v110_v28, 2 }
 0x1de   :  { %v112_v30 = vadd.f32 %v111_v29, %v110_v28 }
 0x1e0   :  { %v113_v31 = vrot.slane %v112_v30, 1 }
 0x1e2   :  { %v114_v32 = vadd.f32 %v113_v31, %v112_v30 }
 0x1e4   :  { %144 = vpush %v114_v32 }
 0x215   :  { %s145_s13 = spop %144 }
 0x216   :  { %v116_v33 = vstv %s145_s13 }
 0x217   :  { %117 = vst [vmem:[#allocation3] sm:$0xff] %v116_v33 }
 0x218   :  { %166 = shalt.err (!%p163_p4)
}
 0x219   :  { %s167_s17 = scalar_lea.hbm %s221_s2, 128 }
 0x21a   :  { %p168_p5 = scmp.ne.s32.totalorder %s221_s2, %s167_s17  ;;  %p171_p6 = scmp.lt.u32.totalorder %s167_s17, %s221_s2 }
 0x21c   :  { %p173_p7 = pnand %p171_p6, %p168_p5 }
 0x21e   :  { %176 = shalt.err (!%p173_p7)
}
 0x21f   :  { %127 = dma.vmem_to_hbm [thread:$0]  %s125_s1, 128, %s221_s2, [#allocation4]  }
 0x220   :  { %177 = dma.done.wait [#allocation4], 128  }
 0x221   :  { %178 = vsyncadd [#allocation4], 4294967168 }
 0x222   :  { %131 = vsyncpa [#allocation4], 1 }

</bundles_post_ra>
